<compile_context>
chip_gen: v5e
topology: v5e:2x2
jax: 0.10.0
libtpu: 0.0.40
codegen_flags: <defaults>
</compile_context>

<pallas_src>
import functools

import jax
import jax.numpy as jnp
from jax.experimental import pallas as pl
from jax.experimental.pallas import tpu as pltpu


def _round_up(x, m):
    return ((x + m - 1) // m) * m


def _vmem_budget_bytes():
    """~85% of physical per-core VMEM (headroom for compiler scratch/sems)."""
    cap = 64 << 20  # conservative fallback (v7x per-TC size)
    try:
        info = pltpu.get_tpu_info()
        cap = int(getattr(info, "vmem_capacity_bytes", cap))
    except Exception:
        pass
    return int(cap * 0.85)


def _choose_hidden_tiling(hid_p, hidden_tile):
    """Pick hidden-chunk size tk (multiple of 128) minimizing padding waste.

    hid_p is the 128-rounded hidden size. Returns (tk, padded_hidden) with
    padded_hidden a multiple of tk, avoiding whole wasted k-steps of zero work.
    """
    cap = _round_up(max(128, min(hidden_tile, hid_p)), 128)
    best = None
    tk = cap
    while tk >= 128:
        n_k = -(-hid_p // tk)
        padded = n_k * tk
        key = (padded - hid_p, n_k)  # minimize waste, then number of chunks
        if best is None or key < best[0]:
            best = (key, tk, padded)
        tk -= 128
    return best[1], best[2]


def prepare_mlp_params(w1, b1, w2, b2, *, hidden_tile=512,
                       compute_dtype=jnp.bfloat16):
    """One-time cast + lane-dense zero-padding of the MLP parameters.

    NOTE: padded b1 entries MUST stay zero (ReLU(0)=0 and padded w2 rows are 0,
    so padded hidden lanes contribute nothing to the output).
    """
    in_features, hidden = w1.shape
    assert w2.shape[0] == hidden and b1.shape[0] == hidden
    out_features = w2.shape[1]

    in_p = _round_up(in_features, 128)
    out_p = _round_up(out_features, 128)
    hid_128 = _round_up(hidden, 128)
    tk, hid_p = _choose_hidden_tiling(hid_128, hidden_tile)

    def pad2(a, shape, dtype):
        a = a.astype(dtype)
        if a.shape == shape:
            return a
        return jnp.zeros(shape, dtype).at[: a.shape[0], : a.shape[1]].set(a)

    w1p = pad2(w1, (in_p, hid_p), compute_dtype)
    w2p = pad2(w2, (hid_p, out_p), compute_dtype)
    b1p = pad2(b1.reshape(1, -1), (1, hid_p), jnp.float32)
    b2p = pad2(b2.reshape(1, -1), (1, out_p), jnp.float32)

    return dict(
        w1=w1p, b1=b1p, w2=w2p, b2=b2p,
        in_features=in_features, hidden=hidden, out_features=out_features,
        in_p=in_p, hid_p=hid_p, out_p=out_p, tk=tk,
        compute_dtype=compute_dtype,
    )


def _mlp_kernel(x_ref, w1_ref, b1_ref, w2_ref, b2_ref, o_ref, acc_ref,
                *, tk, resident):
    """Fused fc1 -> ReLU -> fc2 with the hidden dim reduced along grid axis 1."""
    k = pl.program_id(1)

    @pl.when(k == 0)
    def _():
        # Fold the fc2 bias into the accumulator initialization.
        acc_ref[...] = jnp.broadcast_to(b2_ref[...], acc_ref.shape)

    if resident:
        # Full weights live in VMEM (constant block index -> fetched from HBM
        # exactly once); slice the current hidden chunk in-kernel.
        off = pl.multiple_of(k * tk, 128)
        w1 = w1_ref[:, pl.ds(off, tk)]
        b1 = b1_ref[:, pl.ds(off, tk)]
        w2 = w2_ref[pl.ds(off, tk), :]
    else:
        w1 = w1_ref[...]
        b1 = b1_ref[...]
        w2 = w2_ref[...]

    # fc1 chunk on the MXU: (tm, in_p) @ (in_p, tk) in bf16, f32 accumulation.
    h = jnp.dot(x_ref[...], w1, preferred_element_type=jnp.float32)
    # fc1 bias + ReLU.  Dropout(p=0) is the identity (module default).
    h = jnp.maximum(h + b1, 0.0)

    # fc2 chunk: (tm, tk) @ (tk, out_p) accumulated into the resident f32 acc.
    acc_ref[...] += jnp.dot(h.astype(w2.dtype), w2,
                            preferred_element_type=jnp.float32)

    @pl.when(k == pl.num_programs(1) - 1)
    def _():
        o_ref[...] = acc_ref[...].astype(o_ref.dtype)


def mlp_apply(x, params, *, tile_m=None):
    """x: [..., in_features] -> [..., out_features] using prepared params."""
    cd = params["compute_dtype"]
    in_features = params["in_features"]
    hidden = params["hidden"]
    out_features = params["out_features"]
    in_p, hid_p, out_p, tk = (params["in_p"], params["hid_p"],
                              params["out_p"], params["tk"])

    orig_shape = x.shape
    out_dtype = x.dtype
    x2 = x.reshape(-1, in_features)
    m = x2.shape[0]

    cb = jnp.dtype(cd).itemsize
    ob = jnp.dtype(out_dtype).itemsize
    budget = _vmem_budget_bytes()

    # Resident-weights fast path decision (count default double-buffering).
    w_res_bytes = 2 * (in_p * hid_p + hid_p * out_p) * cb + 2 * (hid_p + out_p) * 4
    resident = w_res_bytes <= int(0.6 * budget)

    def footprint(tm_):
        f = (2 * tm_ * in_p * cb        # x tile (double-buffered)
             + 2 * tm_ * out_p * ob     # output tile (double-buffered)
             + tm_ * out_p * 4          # f32 accumulator scratch
             + tm_ * tk * (4 + cb))     # fc1 intermediate (f32 + bf16 copy)
        if resident:
            f += w_res_bytes
        else:
            f += 2 * (in_p * tk + tk * out_p) * cb + 2 * (tk + out_p) * 4
        return f

    # ---- M-tile selection ---------------------------------------------------
    m_cap = _round_up(m, 16)  # bf16 sublane packing
    if tile_m is None:
        tm = 128
        for cand in (1024, 896, 768, 640, 512, 384, 256, 128):
            if footprint(cand) <= budget:
                tm = cand
                break
        tm = min(tm, m_cap)
        # Keep >=2 tiles on the "parallel" M axis when weights are resident
        # (re-streaming is free in that mode) so both v7x TensorCores get work.
        if resident:
            while tm >= 256 and _round_up(m, tm) // tm < 2:
                tm //= 2
    else:
        tm = min(_round_up(tile_m, 16), m_cap)
    tm = max(16, _round_up(tm, 16))
    m_p = _round_up(m, tm)
    grid = (m_p // tm, hid_p // tk)

    # ---- pad/cast activations only when needed -------------------------------
    x2c = x2.astype(cd)
    if (m_p, in_p) != x2c.shape:
        xp = jnp.zeros((m_p, in_p), cd).at[:m, :in_features].set(x2c)
    else:
        xp = x2c

    # ---- VMEM limit & cost estimate ------------------------------------------
    vmem_limit = int(min(budget, max(32 << 20, int(1.25 * footprint(tm)))))

    n_m = m_p // tm
    w_reads = 1 if resident else n_m
    cost = pl.CostEstimate(
        flops=2 * m * (in_features * hidden + hidden * out_features),
        transcendentals=0,
        bytes_accessed=(m_p * in_p * cb
                        + w_reads * ((in_p * hid_p + hid_p * out_p) * cb
                                     + (hid_p + out_p) * 4)
                        + m_p * out_p * ob),
    )

    # ---- BlockSpecs -----------------------------------------------------------
    if resident:
        in_specs = [
            pl.BlockSpec((tm, in_p), lambda i, k: (i, 0)),      # x tile
            pl.BlockSpec((in_p, hid_p), lambda i, k: (0, 0)),   # w1 (fetched once)
            pl.BlockSpec((1, hid_p), lambda i, k: (0, 0)),      # b1 (fetched once)
            pl.BlockSpec((hid_p, out_p), lambda i, k: (0, 0)),  # w2 (fetched once)
            pl.BlockSpec((1, out_p), lambda i, k: (0, 0)),      # b2
        ]
    else:
        in_specs = [
            pl.BlockSpec((tm, in_p), lambda i, k: (i, 0)),      # x tile
            pl.BlockSpec((in_p, tk), lambda i, k: (0, k)),      # w1 hidden-chunk
            pl.BlockSpec((1, tk), lambda i, k: (0, k)),         # b1 chunk
            pl.BlockSpec((tk, out_p), lambda i, k: (k, 0)),     # w2 hidden-chunk
            pl.BlockSpec((1, out_p), lambda i, k: (0, 0)),      # b2
        ]

    kernel = functools.partial(_mlp_kernel, tk=tk, resident=resident)

    out2 = pl.pallas_call(
        kernel,
        out_shape=jax.ShapeDtypeStruct((m_p, out_p), out_dtype),
        grid_spec=pltpu.PrefetchScalarGridSpec(
            num_scalar_prefetch=0,
            grid=grid,
            in_specs=in_specs,
            out_specs=pl.BlockSpec((tm, out_p), lambda i, k: (i, 0)),
            scratch_shapes=[pltpu.VMEM((tm, out_p), jnp.float32)],
        ),
        compiler_params=pltpu.CompilerParams(
            dimension_semantics=("parallel", "arbitrary"),
            vmem_limit_bytes=vmem_limit,
        ),
        cost_estimate=cost,
    )(xp, params["w1"], params["b1"], params["w2"], params["b2"])

    if (m_p, out_p) != (m, out_features):
        out2 = out2[:m, :out_features]
    return out2.reshape(*orig_shape[:-1], out_features)


def mlp_pallas(x, w1, b1, w2, b2, *, hidden_tile=512, tile_m=None,
               compute_dtype=jnp.bfloat16):
    """Convenience wrapper; for repeated calls, prepare params once instead."""
    params = prepare_mlp_params(w1, b1, w2, b2, hidden_tile=hidden_tile,
                                compute_dtype=compute_dtype)
    return mlp_apply(x, params, tile_m=tile_m)


def _init_params(key, in_features, hidden_features, out_features, dtype=jnp.float32):
    """Deterministic init mimicking nn.Linear's uniform(-1/sqrt(fan_in), +)."""
    k1, k2, k3, k4 = jax.random.split(key, 4)
    lim1 = 1.0 / (in_features ** 0.5)
    lim2 = 1.0 / (hidden_features ** 0.5)
    # stored transposed relative to PyTorch: [in, hidden] and [hidden, out]
    w1 = jax.random.uniform(k1, (in_features, hidden_features), dtype, -lim1, lim1)
    b1 = jax.random.uniform(k2, (hidden_features,), dtype, -lim1, lim1)
    w2 = jax.random.uniform(k3, (hidden_features, out_features), dtype, -lim2, lim2)
    b2 = jax.random.uniform(k4, (out_features,), dtype, -lim2, lim2)
    return w1, b1, w2, b2


if __name__ == "__main__":
    # Small shapes consistent with an MLP applied over the last dim:
    # batch=2, seq=8, in_features=16, hidden=32, out_features=16
    B, S, C_IN, C_HID, C_OUT = 2, 8, 16, 32, 16

    key = jax.random.PRNGKey(0)
    kx, kp = jax.random.split(key)
    x = jax.random.normal(kx, (B, S, C_IN), dtype=jnp.float32)
    w1, b1, w2, b2 = _init_params(kp, C_IN, C_HID, C_OUT)

    # Hoist the weight cast/pad out of the per-call path (done once here).
    params = prepare_mlp_params(w1, b1, w2, b2)

    out = jax.block_until_ready(mlp_apply(x, params))
    assert out.shape == (B, S, C_OUT)

    # Reference matching the kernel's bf16-matmul / f32-accumulate compute path.
    x2 = x.reshape(-1, C_IN)
    h_bf = jnp.maximum(
        jnp.dot(x2.astype(jnp.bfloat16), w1.astype(jnp.bfloat16),
                preferred_element_type=jnp.float32) + b1, 0.0)
    ref_bf16 = (jnp.dot(h_bf.astype(jnp.bfloat16), w2.astype(jnp.bfloat16),
                        preferred_element_type=jnp.float32) + b2).reshape(B, S, C_OUT)
    # Full-f32 reference (original PyTorch-module semantics).
    ref_f32 = jnp.maximum(x @ w1 + b1, 0.0) @ w2 + b2

    assert jnp.allclose(out, ref_bf16, atol=1e-3, rtol=1e-3), "mismatch vs bf16 reference"
    assert jnp.allclose(out, ref_f32, atol=5e-2, rtol=5e-2), "mismatch vs f32 reference"

    print("KERNEL_OK")
</pallas_src>

<mosaic_0001>
module attributes {stable_mosaic.version = 11 : i64} {
  func.func @_mlp_kernel(%arg0: i32, %arg1: i32, %arg2: memref<16x128xbf16, #tpu.memory_space<vmem>>, %arg3: memref<128x128xbf16, #tpu.memory_space<vmem>>, %arg4: memref<1x128xf32, #tpu.memory_space<vmem>>, %arg5: memref<128x128xbf16, #tpu.memory_space<vmem>>, %arg6: memref<1x128xf32, #tpu.memory_space<vmem>>, %arg7: memref<16x128xf32, #tpu.memory_space<vmem>>, %arg8: memref<16x128xf32, #tpu.memory_space<vmem>>) attributes {dimension_semantics = [#tpu.dimension_semantics<parallel>, #tpu.dimension_semantics<arbitrary>], iteration_bounds = array<i64: 1, 1>, scalar_prefetch = 0 : i64, scratch_operands = 1 : i64, tpu.core_type = #tpu.core_type<tc>, window_params = [{transform_indices = @transform_0, window_bounds = array<i64: 16, 128>}, {pipeline_mode = #tpu.pipeline_mode<synchronous>, transform_indices = @transform_1, window_bounds = array<i64: 128, 128>}, {pipeline_mode = #tpu.pipeline_mode<synchronous>, transform_indices = @transform_2, window_bounds = array<i64: 1, 128>}, {pipeline_mode = #tpu.pipeline_mode<synchronous>, transform_indices = @transform_3, window_bounds = array<i64: 128, 128>}, {pipeline_mode = #tpu.pipeline_mode<synchronous>, transform_indices = @transform_4, window_bounds = array<i64: 1, 128>}, {transform_indices = @transform_5, window_bounds = array<i64: 16, 128>}]} {
    %c0_i32 = arith.constant 0 : i32
    %0 = arith.cmpi eq, %arg1, %c0_i32 : i32
    %1 = arith.extui %0 : i1 to i32
    %c0_i32_0 = arith.constant 0 : i32
    %2 = arith.cmpi ne, %1, %c0_i32_0 : i32
    scf.if %2 {
      %c0_13 = arith.constant 0 : index
      %c0_14 = arith.constant 0 : index
      %25 = vector.load %arg6[%c0_13, %c0_14] : memref<1x128xf32, #tpu.memory_space<vmem>>, vector<1x128xf32>
      %26 = vector.shape_cast %25 : vector<1x128xf32> to vector<1x128xf32>
      %27 = vector.broadcast %26 : vector<1x128xf32> to vector<16x128xf32>
      %c0_15 = arith.constant 0 : index
      %c0_16 = arith.constant 0 : index
      %28 = vector.load %arg8[%c0_15, %c0_16] : memref<16x128xf32, #tpu.memory_space<vmem>>, vector<16x128xf32>
      tpu.vector_store %arg8[%c0_15, %c0_16], %27 {strides = array<i32>} : memref<16x128xf32, #tpu.memory_space<vmem>>, vector<16x128xf32>,
    } else {
    }
    %c128_i32 = arith.constant 128 : i32
    %3 = arith.muli %arg1, %c128_i32 : i32
    %4 = tpu.assume_multiple %3, 128 : i32
    %c0 = arith.constant 0 : index
    %5 = arith.index_cast %4 : i32 to index
    %6 = vector.load %arg3[%c0, %5] : memref<128x128xbf16, #tpu.memory_space<vmem>>, vector<128x128xbf16>
    %c0_1 = arith.constant 0 : index
    %7 = arith.index_cast %4 : i32 to index
    %8 = vector.load %arg4[%c0_1, %7] : memref<1x128xf32, #tpu.memory_space<vmem>>, vector<1x128xf32>
    %9 = arith.index_cast %4 : i32 to index
    %c0_2 = arith.constant 0 : index
    %10 = vector.load %arg5[%9, %c0_2] : memref<128x128xbf16, #tpu.memory_space<vmem>>, vector<128x128xbf16>
    %c0_3 = arith.constant 0 : index
    %c0_4 = arith.constant 0 : index
    %11 = vector.load %arg2[%c0_3, %c0_4] : memref<16x128xbf16, #tpu.memory_space<vmem>>, vector<16x128xbf16>
    %cst = arith.constant dense<0.000000e+00> : vector<16x128xf32>
    %12 = tpu.matmul %11, %6, %cst {dimension_numbers = #tpu.dot_dimension_numbers<[1], [0], [0], [1], [0, 0, 1, 1], [], []>} : vector<16x128xbf16>, vector<128x128xbf16>, vector<16x128xf32> -> vector<16x128xf32>
    %13 = vector.broadcast %8 : vector<1x128xf32> to vector<16x128xf32>
    %14 = arith.addf %12, %13 : vector<16x128xf32>
    %cst_5 = arith.constant 0.000000e+00 : f32
    %15 = vector.broadcast %cst_5 : f32 to vector<16x128xf32>
    %16 = arith.maximumf %14, %15 : vector<16x128xf32>
    %c0_6 = arith.constant 0 : index
    %c0_7 = arith.constant 0 : index
    %17 = vector.load %arg8[%c0_6, %c0_7] : memref<16x128xf32, #tpu.memory_space<vmem>>, vector<16x128xf32>
    %18 = arith.truncf %16 : vector<16x128xf32> to vector<16x128xbf16>
    %cst_8 = arith.constant dense<0.000000e+00> : vector<16x128xf32>
    %19 = tpu.matmul %18, %10, %cst_8 {dimension_numbers = #tpu.dot_dimension_numbers<[1], [0], [0], [1], [0, 0, 1, 1], [], []>} : vector<16x128xbf16>, vector<128x128xbf16>, vector<16x128xf32> -> vector<16x128xf32>
    %20 = arith.addf %17, %19 : vector<16x128xf32>
    %c0_9 = arith.constant 0 : index
    %c0_10 = arith.constant 0 : index
    %21 = vector.load %arg8[%c0_9, %c0_10] : memref<16x128xf32, #tpu.memory_space<vmem>>, vector<16x128xf32>
    tpu.vector_store %arg8[%c0_9, %c0_10], %20 {strides = array<i32>} : memref<16x128xf32, #tpu.memory_space<vmem>>, vector<16x128xf32>,
    %c0_i32_11 = arith.constant 0 : i32
    %22 = arith.cmpi eq, %arg1, %c0_i32_11 : i32
    %23 = arith.extui %22 : i1 to i32
    %c0_i32_12 = arith.constant 0 : i32
    %24 = arith.cmpi ne, %23, %c0_i32_12 : i32
    scf.if %24 {
      %c0_13 = arith.constant 0 : index
      %c0_14 = arith.constant 0 : index
      %25 = vector.load %arg8[%c0_13, %c0_14] : memref<16x128xf32, #tpu.memory_space<vmem>>, vector<16x128xf32>
      %c0_15 = arith.constant 0 : index
      %c0_16 = arith.constant 0 : index
      %26 = vector.load %arg7[%c0_15, %c0_16] : memref<16x128xf32, #tpu.memory_space<vmem>>, vector<16x128xf32>
      tpu.vector_store %arg7[%c0_15, %c0_16], %25 {strides = array<i32>} : memref<16x128xf32, #tpu.memory_space<vmem>>, vector<16x128xf32>,
    } else {
    }
    return
  }
  func.func @transform_0(%arg0: i32, %arg1: i32) -> (i32, i32) {
    %c0_i32 = arith.constant 0 : i32
    %c0_i32_0 = arith.constant 0 : i32
    return %arg0, %c0_i32 : i32, i32
  }
  func.func @transform_1(%arg0: i32, %arg1: i32) -> (i32, i32) {
    %c0_i32 = arith.constant 0 : i32
    %c0_i32_0 = arith.constant 0 : i32
    %c0_i32_1 = arith.constant 0 : i32
    return %c0_i32, %c0_i32_0 : i32, i32
  }
  func.func @transform_2(%arg0: i32, %arg1: i32) -> (i32, i32) {
    %c0_i32 = arith.constant 0 : i32
    %c0_i32_0 = arith.constant 0 : i32
    %c0_i32_1 = arith.constant 0 : i32
    return %c0_i32, %c0_i32_0 : i32, i32
  }
  func.func @transform_3(%arg0: i32, %arg1: i32) -> (i32, i32) {
    %c0_i32 = arith.constant 0 : i32
    %c0_i32_0 = arith.constant 0 : i32
    %c0_i32_1 = arith.constant 0 : i32
    return %c0_i32, %c0_i32_0 : i32, i32
  }
  func.func @transform_4(%arg0: i32, %arg1: i32) -> (i32, i32) {
    %c0_i32 = arith.constant 0 : i32
    %c0_i32_0 = arith.constant 0 : i32
    %c0_i32_1 = arith.constant 0 : i32
    return %c0_i32, %c0_i32_0 : i32, i32
  }
  func.func @transform_5(%arg0: i32, %arg1: i32) -> (i32, i32) {
    %c0_i32 = arith.constant 0 : i32
    %c0_i32_0 = arith.constant 0 : i32
    return %arg0, %c0_i32 : i32, i32
  }
}

</mosaic_0001>

<bundles_post_ra>
// kernel: tpu_custom_call.1
= control target key start
LH: loop header
LB: loop body
LE: loop exit
PB: predicated region body
PF: predicated region fallthrough
CT: control target
= control target key end

     0   :  { %10 = vsyncpa [#allocation4], 0  ;;  %s550_s0 = inlined_call_operand.hbm [shape: bf16[16,128], index: 0, kind: input, shape index: {}]   ;;  %s551_s1 = inlined_call_operand.hbm [shape: bf16[128,128], index: 1, kind: input, shape index: {}]   ;;  %s552_s2 = inlined_call_operand.vmem [shape: f32[1,128], index: 2, kind: input, shape index: {}]   ;;  %s553_s3 = inlined_call_operand.hbm [shape: bf16[128,128], index: 3, kind: input, shape index: {}]   ;;  %s554_s4 = inlined_call_operand.vmem [shape: f32[1,128], index: 4, kind: input, shape index: {}]   ;;  %s555_s5 = inlined_call_operand.hbm [shape: f32[16,128], index: 5, kind: output, shape index: {}]  }
   0x1   :  { %11 = vsyncpa [#allocation7], 0 }
   0x2   :  { %12 = vsyncpa [#allocation5], 0  ;;  %s30_s20 = sshll.u32 %s551_s1, 4  ;;  %s494_s21 = smov [#allocation6]   ;;  %s31_s20 = int_to_ptr.hbm [resolvable:$true] %s30_s20 }
   0x3   :  { %s32_s22 = sshll.u32 %s494_s21, 4  ;;  %s17_s25 = sshll.u32 %s550_s0, 4  ;;  %s33_s22 = int_to_ptr.vmem [resolvable:$true] %s32_s22  ;;  %s18_s25 = int_to_ptr.hbm [resolvable:$true] %s17_s25 }
   0x4   :  { %s495_s26 = smov 64   ;;  %s496_s27 = smov 4  }
   0x5   :  { %38 = dma.hbm_to_vmem [thread:$0]  %s31_s20, 1024, %s33_s22, [#allocation7], %s495_s26, %s495_s26, %s496_s27  }
   0x6   :  { %s497_s28 = smov [#allocation3]   ;;  %s45_s7 = sshll.u32 %s553_s3, 4  ;;  %s46_s7 = int_to_ptr.hbm [resolvable:$true] %s45_s7 }
   0x7   :  { %s19_s29 = sshll.u32 %s497_s28, 4  ;;  %s498_s1 = smov [#allocation8]   ;;  %s20_s29 = int_to_ptr.vmem [resolvable:$true] %s19_s29 }
   0x8   :  { %25 = dma.hbm_to_vmem [thread:$0]  %s18_s25, 128, %s20_s29, [#allocation4], %s495_s26, %s495_s26, %s496_s27  }
   0x9   :  { %s47_s8 = sshll.u32 %s498_s1, 4  ;;  %s48_s8 = int_to_ptr.vmem [resolvable:$true] %s47_s8 }
   0xa   :  { %53 = dma.hbm_to_vmem [thread:$0]  %s46_s7, 1024, %s48_s8, [#allocation7], %s495_s26, %s495_s26, %s496_s27  }
   0xb   :  { %488 = dma.done.wait [#allocation4], 128  }
   0xc   :  { %489 = vsyncadd [#allocation4], 4294967168 }
   0xd   :  { %490 = dma.done.wait [#allocation7], 2048  }
   0xe   :  { %491 = vsyncadd [#allocation7], 4294965248  ;;  %v372_v0 = vld [vmem:[#allocation6 + $0x38] sm:$0xff]  ;;  %v371_v1 = vld [vmem:[#allocation6 + $0x30] sm:$0xff]  ;;  %s499_s11 = smov [#allocation9]   ;;  %s500_s15 = smov 128  }
   0xf   :  { %180 = vmatpush.bf16.msra.mxu0 %v372_v0  ;;  %v380_v2 = vld [vmem:[#allocation8 + $0x38] sm:$0xff]  ;;  %v379_v3 = vld [vmem:[#allocation8 + $0x30] sm:$0xff]  ;;  %v370_v4 = vld [vmem:[#allocation6 + $0x28] sm:$0xff]  ;;  %s276_s12 = sshll.u32 %s499_s11, 4  ;;  %s501_s16 = smov 8   ;;  %s277_s12 = int_to_ptr.vmem [resolvable:$true] %s276_s12 }
  0x10   :  { %247 = vmatpush.bf16.msra.mxu1 %v380_v2  ;;  %v378_v5 = vld [vmem:[#allocation8 + $0x28] sm:$0xff]  ;;  %v369_v6 = vld [vmem:[#allocation6 + $0x20] sm:$0xff]  ;;  %v368_v8 = vld [vmem:[#allocation6 + $0x18] sm:$0xff] }
  0x11   :  { %v377_v7 = vld [vmem:[#allocation8 + $0x20] sm:$0xff]  ;;  %v367_v9 = vld [vmem:[#allocation6 + $0x10] sm:$0xff]  ;;  %v366_v10 = vld [vmem:[#allocation6 + $0x8] sm:$0xff] }
  0x12   :  { %v365_v11 = vld [vmem:[#allocation6] sm:$0xff]  ;;  %v381_v12 = vld [vmem:[#allocation3] sm:$0xff]  ;;  %v375_v14 = vld [vmem:[#allocation8 + $0x10] sm:$0xff] }
  0x13   :  { %181 = vmatpush.bf16.msra.mxu0 %v371_v1  ;;  %v376_v13 = vld [vmem:[#allocation8 + $0x18] sm:$0xff]  ;;  %v374_v15 = vld [vmem:[#allocation8 + $0x8] sm:$0xff]  ;;  %v373_v16 = vld [vmem:[#allocation8] sm:$0xff] }
  0x14   :  { %248 = vmatpush.bf16.msra.mxu1 %v379_v3  ;;  %v390_v18 = vld [vmem:[%s552_s2] ss:$0 sm:$0xff]  ;;  %s278_s2 = sshll.u32 %s555_s5, 4  ;;  %s279_s2 = int_to_ptr.hbm [resolvable:$true] %s278_s2 }
  0x15   :  { %v391_v25 = vld [vmem:[%s554_s4] ss:$0 sm:$0xff] }
  0x17   :  { %182 = vmatpush.bf16.msra.mxu0 %v370_v4 }
  0x18   :  { %249 = vmatpush.bf16.msra.mxu1 %v378_v5 }
  0x1b   :  { %183 = vmatpush.bf16.msra.mxu0 %v369_v6 }
  0x1c   :  { %250 = vmatpush.bf16.msra.mxu1 %v377_v7 }
  0x1f   :  { %184 = vmatpush.bf16.msra.mxu0 %v368_v8 }
  0x20   :  { %251 = vmatpush.bf16.msra.mxu1 %v376_v13 }
  0x23   :  { %185 = vmatpush.bf16.msra.mxu0 %v367_v9 }
  0x24   :  { %252 = vmatpush.bf16.msra.mxu1 %v375_v14 }
  0x27   :  { %186 = vmatpush.bf16.msra.mxu0 %v366_v10 }
  0x28   :  { %253 = vmatpush.bf16.msra.mxu1 %v374_v15 }
  0x2b   :  { %187 = vmatpush.bf16.msra.mxu0 %v365_v11 }
  0x2c   :  { %254 = vmatpush.bf16.msra.mxu1 %v373_v16 }
  0x2e   :  { %188 = vmatmul.bf16.vlgmr.msra.gmra.mxu0 %v381_v12 }
  0xab   :  { %v189_v17 = vpop.f32.mrf.mxu0 }
  0xac   :  { %v190_v19 = vadd.f32 %v390_v18, %v189_v17 }
  0xae   :  { %v194_v22 = vmax.f32 %v190_v19, 0.0 }
  0xb3   :  { %v191_v20 = vpop.f32.mrf.mxu0 }
  0xb4   :  { %v192_v21 = vadd.f32 %v390_v18, %v191_v20 }
  0xb6   :  { %v195_v23 = vmax.f32 %v192_v21, 0.0 }
  0xb8   :  { %v198_v24 = vpack.c.bf16 %v195_v23, %v194_v22 }
  0xba   :  { %255 = vmatmul.bf16.vlgmr.msra.gmra.mxu1 %v198_v24 }
 0x137   :  { %v256_v26 = vpop.f32.mrf.mxu1 }
 0x138   :  { %v261_v27 = vadd.f32 %v391_v25, %v256_v26 }
 0x13a   :  { %270 = vst [vmem:[#allocation9] sm:$0xff] %v261_v27 }
 0x13f   :  { %v258_v28 = vpop.f32.mrf.mxu1 }
 0x140   :  { %v262_v29 = vadd.f32 %v391_v25, %v258_v28 }
 0x142   :  { %271 = vst [vmem:[#allocation9 + $0x8] sm:$0xff] %v262_v29 }
 0x143   :  { %284 = dma.vmem_to_hbm [thread:$0]  %s277_s12, 256, %s279_s2, [#allocation5], %s500_s15, %s500_s15, %s501_s16  }
 0x144   :  { %492 = dma.done.wait [#allocation5], 256  }
 0x145   :  { %493 = vsyncadd [#allocation5], 4294967040 }
 0x146   :  { %289 = vsyncpa [#allocation4], 1 }
 0x147   :  { %290 = vsyncpa [#allocation7], 1 }
 0x148   :  { %291 = vsyncpa [#allocation5], 1 }

</bundles_post_ra>
